<compile_context>
chip_gen: v7x
topology: tpu7x:2x2x1
jax: 0.10.0
libtpu: 0.0.40
codegen_flags: <defaults>
</compile_context>

<pallas_src>
import functools

import jax
import jax.numpy as jnp
from jax.experimental import pallas as pl
from jax.experimental.pallas import tpu as pltpu

NUM_CLASS = 16
GAMMA = 2
SMOOTH = 1e-4
IGNORE_ID = -100
AVERAGE_EPS = 1.0


def _focal_loss_kernel(logit_ref, target_ref, alpha_ref, out_ref,
                       loss_acc, mask_acc,
                       *, gamma, smooth, ignore_id, average_eps,
                       seq_len, block_seq):
    # logit_ref : (C, TS)  -- classes on sublanes, sequence on lanes
    # target_ref: (1, TS)  int32
    # alpha_ref : (C, 1)   f32
    # out_ref   : (1, 1)   f32 final scalar (written on last grid step)
    # loss_acc / mask_acc : (1, 1) f32 VMEM scratch accumulators
    i = pl.program_id(0)

    @pl.when(i == 0)
    def _():
        loss_acc[...] = jnp.zeros_like(loss_acc)
        mask_acc[...] = jnp.zeros_like(mask_acc)

    logits = logit_ref[...].astype(jnp.float32)             # (C, TS)
    tgt = target_ref[...]                                    # (1, TS)
    alpha = alpha_ref[...].astype(jnp.float32)               # (C, 1)

    # Ragged tail handled in-kernel: lanes beyond seq_len hold stale VMEM
    # garbage; every contribution from them goes through a select below.
    pos = i * block_seq + jax.lax.broadcasted_iota(jnp.int32, tgt.shape, 1)
    valid = pos < seq_len                                     # (1, TS)
    ignore = tgt == ignore_id                                 # (1, TS)
    live = jnp.logical_and(valid, jnp.logical_not(ignore))    # (1, TS)

    # temp_target = target - ignore_mask * ignore_id  -> 0 where ignored/padded
    tt = jnp.where(live, tgt, 0)                              # (1, TS)

    # one-hot over the class (sublane) axis
    cls = jax.lax.broadcasted_iota(jnp.int32, logits.shape, 0)   # (C, TS)
    onehot = cls == tt                                            # (C, TS)

    # softmax pieces (16-sublane reductions, XLU) -- never build full prob
    m = jnp.max(logits, axis=0, keepdims=True)                # (1, TS)
    e = jnp.exp(logits - m)                                   # (C, TS)  EUP
    z = jnp.sum(e, axis=0, keepdims=True)                     # (1, TS)
    e_t = jnp.sum(jnp.where(onehot, e, 0.0), axis=0, keepdims=True)

    p_t = e_t / z + smooth                                    # (1, TS)
    logpt = jnp.log(p_t)                                      # (1, TS)  EUP
    alpha_w = jnp.sum(jnp.where(onehot, alpha, 0.0), axis=0, keepdims=True)

    one_minus = 1.0 - p_t
    if gamma == 2:
        pw = one_minus * one_minus                            # stays on VPU
    elif float(gamma).is_integer():
        pw = jax.lax.integer_pow(one_minus, int(gamma))
    else:
        # matches torch.pow semantics (NaN for negative base, float exponent)
        pw = jnp.power(one_minus, gamma)

    loss = -alpha_w * pw * logpt
    loss = jnp.where(live, loss, 0.0)       # select (not mul) kills NaN/garbage
    maskf = jnp.where(live, 1.0, 0.0)

    loss_acc[...] += jnp.sum(loss, axis=-1, keepdims=True)
    mask_acc[...] += jnp.sum(maskf, axis=-1, keepdims=True)

    @pl.when(i == pl.num_programs(0) - 1)
    def _():
        out_ref[...] = loss_acc[...] / (average_eps + mask_acc[...])


def multi_focal_loss(logit, target, alpha=None, *, gamma=GAMMA, smooth=SMOOTH,
                     ignore_id=IGNORE_ID, average_eps=AVERAGE_EPS,
                     block_seq=1024):
    """reduction == 'mean' forward of MultiFocalLoss as a single fused kernel."""
    # TODO(synk): reduction='none' (per-element loss output) not implemented.
    S, C = logit.shape

    if alpha is None:
        alpha = jnp.ones((C,), jnp.float32) - 0.5
    alpha2d = jnp.asarray(alpha, jnp.float32).reshape(C, 1)

    # Sequence tile: a multiple of 128 lanes, no larger than the padded length.
    block_seq = min(block_seq, pl.cdiv(S, 128) * 128)
    block_seq = max(128, (block_seq // 128) * 128)
    nb = pl.cdiv(S, block_seq)                              # partial tail OK

    # Lane-dense layout: classes on sublanes, sequence on the 128-lane axis.
    logit_t = logit.T                                       # (C, S)
    target2d = target.reshape(1, S).astype(jnp.int32)        # (1, S)

    kernel = functools.partial(
        _focal_loss_kernel, gamma=gamma, smooth=smooth, ignore_id=ignore_id,
        average_eps=average_eps, seq_len=S, block_seq=block_seq)

    out = pl.pallas_call(
        kernel,
        out_shape=jax.ShapeDtypeStruct((1, 1), jnp.float32),
        grid=(nb,),
        in_specs=[
            pl.BlockSpec((C, block_seq), lambda i: (0, i)),   # logits (C, TS)
            pl.BlockSpec((1, block_seq), lambda i: (0, i)),   # target (1, TS)
            pl.BlockSpec((C, 1), lambda i: (0, 0)),           # alpha  (C, 1)
        ],
        out_specs=pl.BlockSpec((1, 1), lambda i: (0, 0)),     # resident scalar
        scratch_shapes=[pltpu.VMEM((1, 1), jnp.float32),      # loss accumulator
                        pltpu.VMEM((1, 1), jnp.float32)],     # mask accumulator
        compiler_params=pltpu.CompilerParams(
            dimension_semantics=("arbitrary",)),
    )(logit_t, target2d, alpha2d)

    return out[0, 0]


def ref_multi_focal_loss(logit, target, alpha):
    """Pure-JAX reference mirroring the PyTorch forward (reduction='mean')."""
    prob = jax.nn.softmax(logit.astype(jnp.float32), axis=-1)
    t = target.reshape(-1, 1).astype(jnp.int32)
    ignore = (t == IGNORE_ID).astype(jnp.int32)
    tt = t - ignore * IGNORE_ID
    p = jnp.take_along_axis(prob, tt, axis=1).reshape(-1) + SMOOTH
    logpt = jnp.log(p)
    aw = alpha[tt.squeeze(-1)]
    loss = -aw * (1.0 - p) ** GAMMA * logpt
    mask = (1.0 - ignore).reshape(-1).astype(jnp.float32)
    loss = loss * mask
    return loss.sum() / (AVERAGE_EPS + mask.sum())


def _make_inputs(key, seq, num_class):
    k_logit, k_tgt, k_ign = jax.random.split(key, 3)
    logit = jax.random.normal(k_logit, (seq, num_class), dtype=jnp.float32)
    target = jax.random.randint(k_tgt, (seq,), 0, num_class, dtype=jnp.int32)
    ign = jax.random.uniform(k_ign, (seq,)) < 0.2
    target = jnp.where(ign, IGNORE_ID, target)
    return logit, target


if __name__ == "__main__":
    key = jax.random.PRNGKey(0)
    # alpha=None branch of __init__: ones(num_class) - 0.5 -> 0.5 per class
    alpha = jnp.ones((NUM_CLASS,), dtype=jnp.float32) - 0.5

    # multi-block accumulation, exact single block, ragged (partial) block
    cases = [4096, 1024, 600]
    keys = jax.random.split(key, len(cases))
    for seq, k in zip(cases, keys):
        logit, target = _make_inputs(k, seq, NUM_CLASS)
        loss = multi_focal_loss(logit, target, alpha)
        loss = jax.block_until_ready(loss)
        ref = ref_multi_focal_loss(logit, target, alpha)
        assert jnp.allclose(loss, ref, rtol=1e-4, atol=1e-6), (seq, loss, ref)

    print("KERNEL_OK")
</pallas_src>

<mosaic_0001>
module attributes {stable_mosaic.version = 11 : i64} {
  func.func @_focal_loss_kernel(%arg0: i32, %arg1: memref<16x1024xf32, #tpu.memory_space<vmem>>, %arg2: memref<1x1024xi32, #tpu.memory_space<vmem>>, %arg3: memref<16x1xf32, #tpu.memory_space<vmem>>, %arg4: memref<1x1xf32, #tpu.memory_space<vmem>>, %arg5: memref<1x1xf32, #tpu.memory_space<vmem>>, %arg6: memref<1x1xf32, #tpu.memory_space<vmem>>) attributes {dimension_semantics = [#tpu.dimension_semantics<arbitrary>], iteration_bounds = array<i64: 4>, scalar_prefetch = 0 : i64, scratch_operands = 2 : i64, tpu.core_type = #tpu.core_type<tc>, window_params = [{transform_indices = @transform_0, window_bounds = array<i64: 16, 1024>}, {transform_indices = @transform_1, window_bounds = array<i64: 1, 1024>}, {pipeline_mode = #tpu.pipeline_mode<synchronous>, transform_indices = @transform_2, window_bounds = array<i64: 16, 1>}, {pipeline_mode = #tpu.pipeline_mode<synchronous>, transform_indices = @transform_3, window_bounds = array<i64: 1, 1>}]} {
    %c0_i32 = arith.constant 0 : i32
    %0 = arith.cmpi eq, %arg0, %c0_i32 : i32
    %1 = arith.extui %0 : i1 to i32
    %c0_i32_0 = arith.constant 0 : i32
    %2 = arith.cmpi ne, %1, %c0_i32_0 : i32
    scf.if %2 {
      %cst_30 = arith.constant 0.000000e+00 : f32
      %67 = vector.broadcast %cst_30 : f32 to vector<1x1xf32>
      %c0_31 = arith.constant 0 : index
      %c0_32 = arith.constant 0 : index
      %68 = vector.load %arg5[%c0_31, %c0_32] : memref<1x1xf32, #tpu.memory_space<vmem>>, vector<1x1xf32>
      tpu.vector_store %arg5[%c0_31, %c0_32], %67 {strides = array<i32>} : memref<1x1xf32, #tpu.memory_space<vmem>>, vector<1x1xf32>,
      %cst_33 = arith.constant 0.000000e+00 : f32
      %69 = vector.broadcast %cst_33 : f32 to vector<1x1xf32>
      %c0_34 = arith.constant 0 : index
      %c0_35 = arith.constant 0 : index
      %70 = vector.load %arg6[%c0_34, %c0_35] : memref<1x1xf32, #tpu.memory_space<vmem>>, vector<1x1xf32>
      tpu.vector_store %arg6[%c0_34, %c0_35], %69 {strides = array<i32>} : memref<1x1xf32, #tpu.memory_space<vmem>>, vector<1x1xf32>,
    } else {
    }
    %c0 = arith.constant 0 : index
    %c0_1 = arith.constant 0 : index
    %3 = vector.load %arg1[%c0, %c0_1] : memref<16x1024xf32, #tpu.memory_space<vmem>>, vector<16x1024xf32>
    %c0_2 = arith.constant 0 : index
    %c0_3 = arith.constant 0 : index
    %4 = vector.load %arg2[%c0_2, %c0_3] : memref<1x1024xi32, #tpu.memory_space<vmem>>, vector<1x1024xi32>
    %c0_4 = arith.constant 0 : index
    %c0_5 = arith.constant 0 : index
    %5 = vector.load %arg3[%c0_4, %c0_5] : memref<16x1xf32, #tpu.memory_space<vmem>>, vector<16x1xf32>
    %c1024_i32 = arith.constant 1024 : i32
    %6 = arith.muli %arg0, %c1024_i32 : i32
    %7 = tpu.iota {dimensions = array<i32: 1>} : vector<1x1024xi32>
    %8 = vector.broadcast %6 : i32 to vector<1x1024xi32>
    %9 = arith.addi %8, %7 : vector<1x1024xi32>
    %c4096_i32 = arith.constant 4096 : i32
    %10 = vector.broadcast %c4096_i32 : i32 to vector<1x1024xi32>
    %11 = arith.cmpi slt, %9, %10 : vector<1x1024xi32>
    %c-100_i32 = arith.constant -100 : i32
    %12 = vector.broadcast %c-100_i32 : i32 to vector<1x1024xi32>
    %13 = arith.cmpi eq, %4, %12 : vector<1x1024xi32>
    %cst = arith.constant dense<true> : vector<1x1024xi1>
    %14 = arith.xori %13, %cst : vector<1x1024xi1>
    %15 = arith.andi %11, %14 : vector<1x1024xi1>
    %c0_i32_6 = arith.constant 0 : i32
    %16 = vector.broadcast %c0_i32_6 : i32 to vector<1x1024xi32>
    %17 = arith.select %15, %4, %16 : vector<1x1024xi1>, vector<1x1024xi32>
    %18 = tpu.iota {dimensions = array<i32: 0>} : vector<16x1024xi32>
    %19 = vector.broadcast %17 : vector<1x1024xi32> to vector<16x1024xi32>
    %20 = arith.cmpi eq, %18, %19 : vector<16x1024xi32>
    %cst_7 = arith.constant dense<0xFF800000> : vector<1024xf32>
    %21 = vector.multi_reduction <maximumf>, %3, %cst_7 [0] : vector<16x1024xf32> to vector<1024xf32>
    %22 = vector.shape_cast %21 : vector<1024xf32> to vector<1x1024xf32>
    %23 = vector.broadcast %22 : vector<1x1024xf32> to vector<16x1024xf32>
    %24 = arith.subf %3, %23 : vector<16x1024xf32>
    %25 = math.exp %24 : vector<16x1024xf32>
    %cst_8 = arith.constant dense<0.000000e+00> : vector<1024xf32>
    %26 = vector.multi_reduction <add>, %25, %cst_8 [0] : vector<16x1024xf32> to vector<1024xf32>
    %27 = vector.shape_cast %26 : vector<1024xf32> to vector<1x1024xf32>
    %cst_9 = arith.constant 0.000000e+00 : f32
    %28 = vector.broadcast %cst_9 : f32 to vector<16x1024xf32>
    %29 = arith.select %20, %25, %28 : vector<16x1024xi1>, vector<16x1024xf32>
    %cst_10 = arith.constant dense<0.000000e+00> : vector<1024xf32>
    %30 = vector.multi_reduction <add>, %29, %cst_10 [0] : vector<16x1024xf32> to vector<1024xf32>
    %31 = vector.shape_cast %30 : vector<1024xf32> to vector<1x1024xf32>
    %32 = arith.divf %31, %27 : vector<1x1024xf32>
    %cst_11 = arith.constant 9.99999974E-5 : f32
    %33 = vector.broadcast %cst_11 : f32 to vector<1x1024xf32>
    %34 = arith.addf %32, %33 : vector<1x1024xf32>
    %35 = math.log %34 : vector<1x1024xf32>
    %cst_12 = arith.constant 0.000000e+00 : f32
    %36 = vector.shape_cast %5 : vector<16x1xf32> to vector<16x1xf32>
    %37 = vector.broadcast %36 : vector<16x1xf32> to vector<16x1024xf32>
    %38 = vector.broadcast %cst_12 : f32 to vector<16x1024xf32>
    %39 = arith.select %20, %37, %38 : vector<16x1024xi1>, vector<16x1024xf32>
    %cst_13 = arith.constant dense<0.000000e+00> : vector<1024xf32>
    %40 = vector.multi_reduction <add>, %39, %cst_13 [0] : vector<16x1024xf32> to vector<1024xf32>
    %41 = vector.shape_cast %40 : vector<1024xf32> to vector<1x1024xf32>
    %cst_14 = arith.constant 1.000000e+00 : f32
    %42 = vector.broadcast %cst_14 : f32 to vector<1x1024xf32>
    %43 = arith.subf %42, %34 : vector<1x1024xf32>
    %44 = arith.mulf %43, %43 : vector<1x1024xf32>
    %cst_15 = arith.constant 0.000000e+00 : f32
    %45 = vector.broadcast %cst_15 : f32 to vector<1x1024xf32>
    %46 = arith.subf %45, %41 : vector<1x1024xf32>
    %47 = arith.mulf %46, %44 : vector<1x1024xf32>
    %48 = arith.mulf %47, %35 : vector<1x1024xf32>
    %cst_16 = arith.constant 0.000000e+00 : f32
    %49 = vector.broadcast %cst_16 : f32 to vector<1x1024xf32>
    %50 = arith.select %15, %48, %49 : vector<1x1024xi1>, vector<1x1024xf32>
    %cst_17 = arith.constant 1.000000e+00 : f32
    %cst_18 = arith.constant 0.000000e+00 : f32
    %51 = vector.broadcast %cst_17 : f32 to vector<1x1024xf32>
    %52 = vector.broadcast %cst_18 : f32 to vector<1x1024xf32>
    %53 = arith.select %15, %51, %52 : vector<1x1024xi1>, vector<1x1024xf32>
    %c0_19 = arith.constant 0 : index
    %c0_20 = arith.constant 0 : index
    %54 = vector.load %arg5[%c0_19, %c0_20] : memref<1x1xf32, #tpu.memory_space<vmem>>, vector<1x1xf32>
    %cst_21 = arith.constant dense<0.000000e+00> : vector<1xf32>
    %55 = vector.multi_reduction <add>, %50, %cst_21 [1] : vector<1x1024xf32> to vector<1xf32>
    %56 = vector.shape_cast %55 : vector<1xf32> to vector<1x1xf32>
    %57 = arith.addf %54, %56 : vector<1x1xf32>
    %c0_22 = arith.constant 0 : index
    %c0_23 = arith.constant 0 : index
    %58 = vector.load %arg5[%c0_22, %c0_23] : memref<1x1xf32, #tpu.memory_space<vmem>>, vector<1x1xf32>
    tpu.vector_store %arg5[%c0_22, %c0_23], %57 {strides = array<i32>} : memref<1x1xf32, #tpu.memory_space<vmem>>, vector<1x1xf32>,
    %c0_24 = arith.constant 0 : index
    %c0_25 = arith.constant 0 : index
    %59 = vector.load %arg6[%c0_24, %c0_25] : memref<1x1xf32, #tpu.memory_space<vmem>>, vector<1x1xf32>
    %cst_26 = arith.constant dense<0.000000e+00> : vector<1xf32>
    %60 = vector.multi_reduction <add>, %53, %cst_26 [1] : vector<1x1024xf32> to vector<1xf32>
    %61 = vector.shape_cast %60 : vector<1xf32> to vector<1x1xf32>
    %62 = arith.addf %59, %61 : vector<1x1xf32>
    %c0_27 = arith.constant 0 : index
    %c0_28 = arith.constant 0 : index
    %63 = vector.load %arg6[%c0_27, %c0_28] : memref<1x1xf32, #tpu.memory_space<vmem>>, vector<1x1xf32>
    tpu.vector_store %arg6[%c0_27, %c0_28], %62 {strides = array<i32>} : memref<1x1xf32, #tpu.memory_space<vmem>>, vector<1x1xf32>,
    %c3_i32 = arith.constant 3 : i32
    %64 = arith.cmpi eq, %arg0, %c3_i32 : i32
    %65 = arith.extui %64 : i1 to i32
    %c0_i32_29 = arith.constant 0 : i32
    %66 = arith.cmpi ne, %65, %c0_i32_29 : i32
    scf.if %66 {
      %c0_30 = arith.constant 0 : index
      %c0_31 = arith.constant 0 : index
      %67 = vector.load %arg5[%c0_30, %c0_31] : memref<1x1xf32, #tpu.memory_space<vmem>>, vector<1x1xf32>
      %c0_32 = arith.constant 0 : index
      %c0_33 = arith.constant 0 : index
      %68 = vector.load %arg6[%c0_32, %c0_33] : memref<1x1xf32, #tpu.memory_space<vmem>>, vector<1x1xf32>
      %cst_34 = arith.constant 1.000000e+00 : f32
      %69 = vector.broadcast %cst_34 : f32 to vector<1x1xf32>
      %70 = arith.addf %69, %68 : vector<1x1xf32>
      %71 = arith.divf %67, %70 : vector<1x1xf32>
      %c0_35 = arith.constant 0 : index
      %c0_36 = arith.constant 0 : index
      %72 = vector.load %arg4[%c0_35, %c0_36] : memref<1x1xf32, #tpu.memory_space<vmem>>, vector<1x1xf32>
      tpu.vector_store %arg4[%c0_35, %c0_36], %71 {strides = array<i32>} : memref<1x1xf32, #tpu.memory_space<vmem>>, vector<1x1xf32>,
    } else {
    }
    return
  }
  func.func @transform_0(%arg0: i32) -> (i32, i32) {
    %c0_i32 = arith.constant 0 : i32
    %c0_i32_0 = arith.constant 0 : i32
    return %c0_i32, %arg0 : i32, i32
  }
  func.func @transform_1(%arg0: i32) -> (i32, i32) {
    %c0_i32 = arith.constant 0 : i32
    %c0_i32_0 = arith.constant 0 : i32
    return %c0_i32, %arg0 : i32, i32
  }
  func.func @transform_2(%arg0: i32) -> (i32, i32) {
    %c0_i32 = arith.constant 0 : i32
    %c0_i32_0 = arith.constant 0 : i32
    %c0_i32_1 = arith.constant 0 : i32
    return %c0_i32, %c0_i32_0 : i32, i32
  }
  func.func @transform_3(%arg0: i32) -> (i32, i32) {
    %c0_i32 = arith.constant 0 : i32
    %c0_i32_0 = arith.constant 0 : i32
    %c0_i32_1 = arith.constant 0 : i32
    return %c0_i32, %c0_i32_0 : i32, i32
  }
}

</mosaic_0001>

<bundles_post_ra>
// kernel: tpu_custom_call.1
= control target key start
LH: loop header
LB: loop body
LE: loop exit
PB: predicated region body
PF: predicated region fallthrough
CT: control target
= control target key end

     0   :  { %8 = vsyncpa [#allocation5], 0  ;;  %s1944_s0 = inlined_call_operand.hbm [shape: f32[16,4096], index: 0, kind: input, shape index: {}]   ;;  %s1945_s1 = inlined_call_operand.hbm [shape: s32[1,4096], index: 1, kind: input, shape index: {}]   ;;  %s1946_s2 = inlined_call_operand.vmem [shape: f32[16,1], index: 2, kind: input, shape index: {}]   ;;  %s1947_s3 = inlined_call_operand.hbm [shape: f32[1,1], index: 3, kind: output, shape index: {}]  }
   0x1   :  { %10 = vsyncpa [#allocation5 + $0x1], 0 }
   0x2   :  { %11 = vsyncpa [#allocation8], 0 }
   0x3   :  { %13 = vsyncpa [#allocation8 + $0x1], 0 }
   0x4   :  { %14 = vsyncpa [#allocation6], 0  ;;  %s1260_s12 = smov 0   ;;  %s1262_s13 = smov 0  }
   0x5   :  { %s1264_s14 = smov 0   ;;  %s1266_s15 = smov 0  }
   0x6 LB: > { %s1279_s16 = sadd.s32 4294967295, %s1228_s15   ;;  %s1282_s17 = sadd.s32 1, %s1228_s15   ;;  %s1228_s15 = sphi %s1266_s15, %s2010_s15   ;;  %s1224_s14 = sphi %s1264_s14, %s2009_s14   ;;  %s1220_s13 = sphi %s1262_s13, %s2008_s13   ;;  %s1216_s12 = sphi %s1260_s12, %s2007_s12  }
   0x7   : > { %s24_s18 = ssub.s32 %s1228_s15, %s1282_s17  ;;  %s27_s19 = sadd.s32 1, %s1224_s14 }
   0x8   : > { %p25_p0 = scmp.eq.s32.totalorder %s24_s18, 0  ;;  %p34_p1 = scmp.ne.s32.totalorder %s1224_s14, %s1220_s13 }
   0x9   : > { %p35_p2 = scmp.eq.s32.totalorder %s1228_s15, 0  ;;  %p40_p3 = scmp.ne.s32.totalorder %s1220_s13, %s1216_s12 }
   0xa   : > { %s1292_s20 = scalar_select %p25_p0, %s1224_s14, %s27_s19  }
   0xb   : > { %p36_p4 = por %p35_p2, %p34_p1  ;;  %p41_p5 = scmp.eq.s32.totalorder %s1279_s16, 0 }
   0xc   : > { %p990_p6 = scmp.lt.s32.totalorder %s1228_s15, 4  ;;  %s1301_s22 = sand.u32 1, %s1224_s14  }
   0xd   : > { %p1296_p7 = por %p41_p5, %p40_p3  ;;  %s957_s23 = sshll.u32 %s1301_s22, 7 }
   0xe   : > { %s973_s24 = sshll.u32 %s1228_s15, 10  ;;  %s139_s28 = scalar_lea.vmem [#allocation4], %s957_s23 }
   0xf   : > { %s1962_s21 = scalar_select %p1296_p7, 1, 0 }
  0x10   : > { %s1308_s27 = scalar_lea.hbm %s1944_s0, %s973_s24  ;;  %s146_s29 = sshll.u32 %s139_s28, 4  ;;  %s1310_s29 = int_to_ptr.vmem [resolvable:$true] %s146_s29 }
  0x11   : > { %p1312_p8 = pnand %p990_p6, %p36_p4  ;;  %s136_s4 = scalar_lea.sflag [#allocation5], %s1301_s22 }
  0x12   : > { %s1100_s5 = scalar_lea.hbm %s1308_s27, 2048  ;;  %s1105_s8 = scalar_lea.hbm %s1944_s0, 8192 }
  0x13   : > { %p1101_p9 = scmp.ne.s32.totalorder %s1308_s27, %s1100_s5  ;;  %p1102_p10 = pneg %p1312_p8 }
  0x14   : > { %p1106_p13 = scmp.lt.u32.totalorder %s1308_s27, %s1944_s0  ;;  %p1107_p0 = scmp.lt.u32.totalorder %s1105_s8, %s1100_s5 }
  0x15   : > { %p1103_p11 = pnand %p1102_p10, %p1101_p9  ;;  %p1109_p2 = scmp.lt.u32.totalorder %s1100_s5, %s1308_s27 }
  0x16   : > { %p1108_p1 = por %p1107_p0, %p1106_p13 }
  0x17   : > { %p1104_p12 = pneg %p1103_p11 }
  0x18   : > { %p1110_p3 = por %p1109_p2, %p1108_p1 }
  0x1a   : > { %p1111_p4 = pnand %p1110_p3, %p1104_p12 }
  0x1c   : > { %1114 = shalt.err (!%p1111_p4)
}
  0x1d   : > { %s1115_s11 = scalar_lea.vmem %s1310_s29, 2048  ;;  %s1230_s12 = smov [#allocation4]  }
  0x1e   : > { %p1116_p5 = scmp.ne.s32.totalorder %s1310_s29, %s1115_s11  ;;  %s1120_s18 = sshll.u32 %s1230_s12, 4  ;;  %s1121_s18 = int_to_ptr.vmem [resolvable:$false] %s1120_s18 }
  0x1f   : > { %s1122_s19 = scalar_lea.vmem %s1121_s18, 4096  ;;  %p1123_p11 = scmp.lt.s32.totalorder %s1310_s29, %s1121_s18 }
  0x20   : > { %p1118_p6 = pnand %p1116_p5, %p1102_p10  ;;  %p1124_p13 = scmp.lt.s32.totalorder %s1122_s19, %s1115_s11 }
  0x22   : > { %p1119_p9 = pneg %p1118_p6  ;;  %p1125_p0 = por %p1124_p13, %p1123_p11 }
  0x24   : > { %p1126_p1 = pnand %p1125_p0, %p1119_p9 }
  0x26   : > { %1129 = shalt.err (!%p1126_p1)
}
  0x27   : > { %s1231_s23 = smov 4096   ;;  %s1232_s24 = smov 1024  }
  0x28   : > { %s1233_s25 = smov 64   ;;  %p963_p12 = scmp.ge.s32.totalorder %s1228_s15, 1 }
  0x29   : > { %986 = dma.hbm_to_vmem [thread:$0]  (!%p1312_p8), %s1308_s27, 2048, %s1310_s29, %s136_s4, %s1231_s23, %s1232_s24, %s1233_s25  }
  0x2a   : > { %p173_p2 = scmp.lt.s32.totalorder %s1228_s15, 5  ;;  %s960_s26 = sshll.u32 %s1301_s22, 3 }
  0x2b   : > { %s974_s5 = sshll.u32 %s1228_s15, 7  ;;  %s160_s6 = scalar_lea.vmem [#allocation7], %s960_s26 }
  0x2c   : > { %p1347_p3 = pnand %p963_p12, %p173_p2  ;;  %s168_s7 = sshll.u32 %s160_s6, 4  ;;  %s169_s7 = int_to_ptr.vmem [resolvable:$true] %s168_s7 }
  0x2d   : > { %s1355_s10 = scalar_lea.hbm %s1945_s1, %s974_s5  ;;  %s157_s27 = scalar_lea.sflag [#allocation8], %s1301_s22 }
  0x2e   : > { %s1964_s28 = scalar_select %p1347_p3, 1, 0 }
  0x2f   : > { %s1130_s29 = scalar_lea.hbm %s1355_s10, 128  ;;  %s1135_s11 = scalar_lea.hbm %s1945_s1, 512 }
  0x30   : > { %p1131_p4 = scmp.ne.s32.totalorder %s1355_s10, %s1130_s29  ;;  %p1136_p9 = scmp.lt.u32.totalorder %s1355_s10, %s1945_s1 }
  0x31   : > { %p1137_p11 = scmp.lt.u32.totalorder %s1135_s11, %s1130_s29  ;;  %p1139_p0 = scmp.lt.u32.totalorder %s1130_s29, %s1355_s10 }
  0x32   : > { %p1133_p5 = pnand %p1131_p4, %p1102_p10 }
  0x33   : > { %p1138_p13 = por %p1137_p11, %p1136_p9 }
  0x34   : > { %p1134_p6 = pneg %p1133_p5 }
  0x35   : > { %p1140_p1 = por %p1139_p0, %p1138_p13 }
  0x37   : > { %p1141_p12 = pnand %p1140_p1, %p1134_p6 }
  0x39   : > { %1144 = shalt.err (!%p1141_p12)
}
  0x3a   : > { %s1145_s22 = scalar_lea.vmem %s169_s7, 128  ;;  %s1234_s19 = smov [#allocation7]  }
  0x3b   : > { %p1146_p2 = scmp.ne.s32.totalorder %s169_s7, %s1145_s22  ;;  %s1150_s23 = sshll.u32 %s1234_s19, 4  ;;  %s1151_s23 = int_to_ptr.vmem [resolvable:$false] %s1150_s23 }
  0x3c   : > { %s1152_s24 = scalar_lea.vmem %s1151_s23, 256  ;;  %p1153_p7 = scmp.lt.s32.totalorder %s169_s7, %s1151_s23 }
  0x3d   : > { %p1148_p4 = pnand %p1146_p2, %p1102_p10  ;;  %p1154_p3 = scmp.lt.s32.totalorder %s1152_s24, %s1145_s22 }
  0x3f   : > { %p1149_p5 = pneg %p1148_p4  ;;  %p1155_p9 = por %p1154_p3, %p1153_p7 }
  0x41   : > { %p1156_p11 = pnand %p1155_p9, %p1149_p5 }
  0x43   : > { %1159 = shalt.err (!%p1156_p11)
}
  0x44   : > { %989 = dma.hbm_to_vmem [thread:$0]  (!%p1312_p8), %s1355_s10, 128, %s169_s7, %s157_s27  }
  0x45   : > { %p1965_p6 = scmp.ne.s32.totalorder %s1964_s28, 0 }
  0x46   : > { %s179_s25 = sand.u32 (!%p1965_p6), 1, %s1220_s13   ;;  %p1966_p10 = scmp.ne.s32.totalorder (!%p1965_p6), %s1962_s21, 0 }
  0x47   : > { %177 = sbr.rel (%p1965_p6) target bundleno = 462 (0x1ce), region = 32  ;;  %s964_s26 = sshll.u32 (!%p1965_p6), %s179_s25, 7 }
  0x48   : > { %s180_s5 = scalar_lea.sflag (!%p1965_p6), [#allocation5], %s179_s25  ;;  %s1380_s6 = scalar_lea.vmem (!%p1965_p6), [#allocation4], %s964_s26 }
  0x4e   : > { %1203 = dma.done.wait (%p1966_p10), %s180_s5, 2048  }
  0x4f   : > { %1205 = vsyncadd (%p1966_p10), %s180_s5, 4294965248  ;;  %s965_s8 = sshll.u32 %s179_s25, 3  ;;  %s189_s30 = scalar_lea.sflag [#allocation8], %s179_s25 }
  0x50   : > { %s192_s9 = scalar_lea.vmem [#allocation7], %s965_s8 }
  0x51   : > { %1207 = dma.done.wait (%p1966_p10), %s189_s30, 128  }
  0x52   : > { %1209 = vsyncadd (%p1966_p10), %s189_s30, 4294967168  ;;  %p966_p7 = scmp.ne.s32.totalorder %s1279_s16, 0 }
  0x53   : > { %vm221_vm0 = vcmask (!%p966_p7), 0   ;;  %v1235_v0 = vmov (!%p966_p7), 0.0  }
  0x54   : > { %220 = sbr.rel (%p966_p7) target bundleno = 91 (0x5b), region = 44  ;;  %222 = vst.msk [vmem:[#allocation2] sm:$0x1] (!%p966_p7), %vm221_vm0, %v1235_v0  ;;  %223 = vst.msk [vmem:[#allocation3] sm:$0x1] (!%p966_p7), %vm221_vm0, %v1235_v0 }
  0x5b PF: > { %v241_v1 = vld [vmem:[%s1946_s2] sm:$0xff]  ;;  %v1236_v2 = vmov 0   ;;  %v242_v3 = vld [vmem:[%s1946_s2 + $0x8] sm:$0xff]  ;;  %v244_v10 = vlaneseq  ;;  %s967_s27 = sshll.u32 %s1279_s16, 10  ;;  %vm1237_vm2 = vmmov 1   ;;  %v1422_v17 = vld [vmem:[%s1380_s6 + $0x10] sm:$0xff] }
  0x5c   : > { %1033 = vset.pattern.permute.xlu0 %v1236_v2  ;;  %v1398_v4 = vld [vmem:[%s1380_s6] sm:$0xff]  ;;  %v1406_v7 = vld [vmem:[%s1380_s6 + $0x8] sm:$0xff]  ;;  %v1425_v18 = vld [vmem:[%s1380_s6 + $0x50] sm:$0xff]  ;;  %v1430_v22 = vstv %s967_s27  ;;  %p968_p8 = scmp.ne.s32.totalorder %s1279_s16, 3 }
  0x5d   : > { %686 = vperm.xlu0 %1033, %v241_v1   ;;  %v1401_v5 = vld [vmem:[%s1380_s6 + $0x40] sm:$0xff]  ;;  %v1409_v8 = vld [vmem:[%s1380_s6 + $0x48] sm:$0xff]  ;;  %v1416_v13 = vshrl.u32 %v244_v10, 7  ;;  %v1419_v16 = vand.u32 127, %v244_v10  ;;  %v426_v25 = vmax.f32 %v1422_v17, %v1425_v18  ;;  %v1439_v27 = vld [vmem:[%s1380_s6 + $0x18] sm:$0xff] }
  0x5e   : > { %v412_v6 = vmax.f32 %v1398_v4, %v1401_v5  ;;  %v1411_v9 = vld [vmem:[%s192_s9] sm:$0xff]  ;;  %v419_v12 = vmax.f32 %v1406_v7, %v1409_v8  ;;  %v1442_v28 = vld [vmem:[%s1380_s6 + $0x58] sm:$0xff]  ;;  %v1462_v42 = vld [vmem:[%s1380_s6 + $0x30] sm:$0xff] }
  0x5f   : > { %vm270_vm1 = vcmp.eq.s32.totalorder %v1411_v9, 4294967196  ;;  %v1428_v19 = vsub.s32 0, %v1416_v13  ;;  %v246_v24 = vadd.s32 128, %v1419_v16  ;;  %v279_v26 = vsub.s32 1, %v1416_v13  ;;  %v1453_v37 = vld [vmem:[%s1380_s6 + $0x20] sm:$0xff]  ;;  %v1456_v38 = vld [vmem:[%s1380_s6 + $0x28] sm:$0xff] }
  0x60   : > { %v413_v11 = vrot.slane %v412_v6, 4  ;;  %v420_v15 = vrot.slane %v419_v12, 4  ;;  %vm271_vm3 = vmxor %vm270_vm1, %vm1237_vm2  ;;  %v254_v29 = vadd.s32 %v1430_v22, %v1419_v16  ;;  %v427_v34 = vrot.slane %v426_v25, 4  ;;  %v1459_v39 = vld [vmem:[%s1380_s6 + $0x60] sm:$0xff]  ;;  %v1465_v43 = vld [vmem:[%s1380_s6 + $0x68] sm:$0xff] }
  0x61   : > { %691 = vperm.xlu0 %1033, %v242_v3   ;;  %v1432_v23 = vsel %vm271_vm3, 1, %v1236_v2  ;;  %v255_v33 = vadd.s32 %v1430_v22, %v246_v24  ;;  %v433_v35 = vmax.f32 %v1439_v27, %v1442_v28  ;;  %v1468_v44 = vld [vmem:[%s1380_s6 + $0x70] sm:$0xff]  ;;  %v1471_v45 = vadd.s32 8, %v1416_v13  ;;  %v1484_v52 = vld [vmem:[%s1380_s6 + $0x38] sm:$0xff] }
  0x62   : > { %v414_v14 = vmax.f32 %v412_v6, %v413_v11  ;;  %v421_v21 = vmax.f32 %v419_v12, %v420_v15  ;;  %v276_v30 = vrot.slane %v1432_v23, %v1428_v19  ;;  %v280_v36 = vrot.slane %v1432_v23, %v279_v26  ;;  %v1487_v53 = vld [vmem:[%s1380_s6 + $0x78] sm:$0xff] }
  0x63   : > { %vm262_vm4 = vcmp.lt.s32.totalorder %v254_v29, 4096  ;;  %v324_v46 = vrot.slane %v1411_v9, %v1428_v19  ;;  %v328_v47 = vrot.slane %v1411_v9, %v279_v26  ;;  %vm263_vm6 = vcmp.lt.s32.totalorder %v255_v33, 4096 }
  0x64   : > { %v415_v20 = vrot.slane %v414_v14, 2  ;;  %v422_v32 = vrot.slane %v421_v21, 2  ;;  %vm305_vm5 = vcmp.ne.s32.totalorder %v276_v30, 0  ;;  %v428_v48 = vmax.f32 %v426_v25, %v427_v34 }
  0x65   : > { %v434_v49 = vrot.slane %v433_v35, 4  ;;  %v440_v50 = vmax.f32 %v1453_v37, %v1459_v39  ;;  %vm306_vm7 = vcmp.ne.s32.totalorder %v280_v36, 0  ;;  %vm1479_vm8 = vmand %vm262_vm4, %vm305_vm5  ;;  %v247_v54 = vadd.s32 256, %v1419_v16 }
  0x66   : > { %v416_v31 = vmax.f32 %v414_v14, %v415_v20  ;;  %v423_v41 = vmax.f32 %v421_v21, %v422_v32  ;;  %v447_v55 = vmax.f32 %v1456_v38, %v1465_v43  ;;  %v454_v56 = vmax.f32 %v1462_v42, %v1468_v44  ;;  %vm1504_vm9 = vmand %vm263_vm6, %vm306_vm7 }
  0x67   : > { %v248_v59 = vadd.s32 384, %v1419_v16  ;;  %v429_v60 = vrot.slane %v428_v48, 2  ;;  %v249_v61 = vadd.s32 512, %v1419_v16  ;;  %v435_v62 = vmax.f32 %v433_v35, %v434_v49 }
  0x68   : > { %v417_v40 = vrot.slane %v416_v31, 1  ;;  %v424_v58 = vrot.slane %v423_v41, 1  ;;  %v441_v63 = vrot.slane %v440_v50, 4  ;;  %v448_v0 = vrot.slane %v447_v55, 4 }
  0x69   : > { %v353_v1 = vsel %vm1479_vm8, %v324_v46, 0  ;;  %v430_v2 = vmax.f32 %v428_v48, %v429_v60  ;;  %v455_v3 = vrot.slane %v454_v56, 4  ;;  %v461_v6 = vmax.f32 %v1484_v52, %v1487_v53 }
  0x6a   : > { %v418_v57 = vmax.f32 %v416_v31, %v417_v40  ;;  %v250_v10 = vadd.s32 640, %v1419_v16  ;;  %v436_v11 = vrot.slane %v435_v62, 2  ;;  %v442_v12 = vmax.f32 %v440_v50, %v441_v63 }
  0x6b   : > { %v449_v14 = vmax.f32 %v447_v55, %v448_v0  ;;  %v425_v15 = vmax.f32 %v423_v41, %v424_v58  ;;  %v456_v21 = vmax.f32 %v454_v56, %v455_v3  ;;  %v462_v24 = vrot.slane %v461_v6, 4 }
  0x6c   : > { %v468_v20 = vsub.f32 %v1398_v4, %v418_v57  ;;  %v431_v26 = vrot.slane %v430_v2, 1  ;;  %v437_v29 = vmax.f32 %v435_v62, %v436_v11  ;;  %v443_v30 = vrot.slane %v442_v12, 2 }
  0x6d   : > { %v450_v31 = vrot.slane %v449_v14, 2  ;;  %v476_v32 = vsub.f32 %v1401_v5, %v418_v57  ;;  %v251_v34 = vadd.s32 768, %v1419_v16  ;;  %v457_v35 = vrot.slane %v456_v21, 2 }
  0x6e   : > { %v463_v40 = vmax.f32 %v461_v6, %v462_v24  ;;  %v252_v4 = vadd.s32 896, %v1419_v16  ;;  %v438_v41 = vrot.slane %v437_v29, 1  ;;  %v444_v46 = vmax.f32 %v442_v12, %v443_v30 }
  0x6f   : > { %v451_v36 = vmax.f32 %v449_v14, %v450_v31  ;;  %v354_v33 = vsel %vm1504_vm9, %v328_v47, 0  ;;  %v469_v48 = vsub.f32 %v1406_v7, %v425_v15  ;;  %v458_v49 = vmax.f32 %v456_v21, %v457_v35 }
  0x70   : > { %v464_v50 = vrot.slane %v463_v40, 2  ;;  %v477_v55 = vsub.f32 %v1409_v8, %v425_v15  ;;  %v484_v56 = vmul.f32 1.442695, %v468_v20  ;;  %v432_v5 = vmax.f32 %v430_v2, %v431_v26 }
  0x71   : > { %v445_v57 = vrot.slane %v444_v46, 1  ;;  %v500_v58 = vmul.f32 1.442695, %v476_v32  ;;  %v439_v60 = vmax.f32 %v437_v29, %v438_v41  ;;  %v452_v62 = vrot.slane %v451_v36, 1 }
  0x72   : > { %v465_v63 = vmax.f32 %v463_v40, %v464_v50  ;;  %v1516_v16 = vrot.slane %v353_v1, %v1428_v19  ;;  %v1519_v0 = vrot.slane %v354_v33, %v1428_v19  ;;  %v1522_v47 = vadd.s32 %v1430_v22, %v247_v54 }
  0x73   : > { %v459_v7 = vrot.slane %v458_v49, 1  ;;  %v1525_v3 = vadd.s32 %v1430_v22, %v248_v59  ;;  %v1528_v8 = vadd.s32 %v1430_v22, %v249_v61  ;;  %v1531_v2 = vadd.s32 %v1430_v22, %v250_v10 }
  0x74   : > { %v466_v6 = vrot.slane %v465_v63, 1  ;;  %1034 = vpow2.f32 %v484_v56  ;;  %v486_v1 = vmul.f32 1.442695, %v469_v48  ;;  %v446_v11 = vmax.f32 %v444_v46, %v445_v57 }
  0x75   : > { %v470_v12 = vsub.f32 %v1422_v17, %v432_v5  ;;  %1036 = vpow2.f32 %v500_v58  ;;  %v502_v14 = vmul.f32 1.442695, %v477_v55  ;;  %v453_v54 = vmax.f32 %v451_v36, %v452_v62 }
  0x76   : > { %v471_v15 = vsub.f32 %v1439_v27, %v439_v60  ;;  %v1536_v59 = vadd.s32 %v1430_v22, %v251_v34  ;;  %v283_v61 = vsub.s32 2, %v1416_v13  ;;  %v460_v20 = vmax.f32 %v458_v49, %v459_v7 }
  0x77   : > { %v478_v10 = vsub.f32 %v1425_v18, %v432_v5  ;;  %v1541_v21 = vadd.s32 %v1430_v22, %v252_v4  ;;  %v287_v24 = vsub.s32 3, %v1416_v13  ;;  %v467_v26 = vmax.f32 %v465_v63, %v466_v6 }
  0x78   : > { %v479_v17 = vsub.f32 %v1442_v28, %v439_v60  ;;  %1038 = vpow2.f32 %v486_v1  ;;  %vm264_vm10 = vcmp.lt.s32.totalorder %v1522_v47, 4096  ;;  %v291_v27 = vsub.s32 4, %v1416_v13 }
  0x79   : > { %v472_v29 = vsub.f32 %v1453_v37, %v446_v11  ;;  %v488_v30 = vmul.f32 1.442695, %v470_v12  ;;  %1040 = vpow2.f32 %v502_v14  ;;  %vm265_vm11 = vcmp.lt.s32.totalorder %v1525_v3, 4096 }
  0x7a   : > { %v473_v18 = vsub.f32 %v1456_v38, %v453_v54  ;;  %v490_v22 = vmul.f32 1.442695, %v471_v15  ;;  %vm266_vm12 = vcmp.lt.s32.totalorder %v1528_v8, 4096  ;;  %v284_v31 = vrot.slane %v1432_v23, %v283_v61 }
  0x7b   : > { %v474_v28 = vsub.f32 %v1462_v42, %v460_v20  ;;  %v504_v32 = vmul.f32 1.442695, %v478_v10  ;;  %vm267_vm13 = vcmp.lt.s32.totalorder %v1531_v2, 4096  ;;  %v288_v34 = vrot.slane %v1432_v23, %v287_v24 }
  0x7c   : > { %v295_v37 = vsub.s32 5, %v1416_v13  ;;  %v475_v35 = vsub.f32 %v1484_v52, %v467_v26  ;;  %v506_v40 = vmul.f32 1.442695, %v479_v17  ;;  %v292_v4 = vrot.slane %v1432_v23, %v291_v27 }
  0x7d   : > { %v480_v38 = vsub.f32 %v1459_v39, %v446_v11  ;;  %1042 = vpow2.f32 %v488_v30  ;;  %v492_v41 = vmul.f32 1.442695, %v472_v29  ;;  %v299_v46 = vsub.s32 6, %v1416_v13 }
  0x7e   : > { %v481_v42 = vsub.f32 %v1465_v43, %v453_v54  ;;  %1044 = vpow2.f32 %v490_v22  ;;  %v494_v36 = vmul.f32 1.442695, %v473_v18  ;;  %v1035_v33 = vpop.eup %1034  ;;  %vm1956_vm14 = vcmp.eq.s32.totalorder %v1416_v13, %v1516_v16 }
  0x7f   : > { %vm1950_vm15 = vcmp.eq.s32.totalorder %v1471_v45, %v1516_v16  ;;  %v303_v52 = vsub.s32 7, %v1416_v13  ;;  %v482_v48 = vsub.f32 %v1468_v44, %v460_v20  ;;  %v496_v39 = vmul.f32 1.442695, %v474_v28  ;;  %v1037_v49 = vpop.eup %1036 }
  0x80   : > { %1046 = vpow2.f32 %v504_v32  ;;  %v296_v50 = vrot.slane %v1432_v23, %v295_v37  ;;  %v483_v43 = vsub.f32 %v1487_v53, %v467_v26  ;;  %v498_v55 = vmul.f32 1.442695, %v475_v35 }
  0x81   : > { %1048 = vpow2.f32 %v506_v40  ;;  %vm307_vm0 = vcmp.ne.s32.totalorder %v284_v31, 0  ;;  %vm308_vm1 = vcmp.ne.s32.totalorder %v288_v34, 0  ;;  %v508_v56 = vmul.f32 1.442695, %v480_v38 }
  0x82   : > { %1050 = vpow2.f32 %v492_v41  ;;  %v300_v5 = vrot.slane %v1432_v23, %v299_v46  ;;  %vm309_vm2 = vcmp.ne.s32.totalorder %v292_v4, 0  ;;  %v510_v57 = vmul.f32 1.442695, %v481_v42  ;;  %v1039_v58 = vpop.eup %1038  ;;  %vm1574_vm4 = vmand %vm264_vm10, %vm307_vm0 }
  0x83   : > { %1052 = vpow2.f32 %v494_v36  ;;  %v516_v44 = vadd.f32 %v1037_v49, %v1035_v33  ;;  %v304_v60 = vrot.slane %v1432_v23, %v303_v52  ;;  %v512_v62 = vmul.f32 1.442695, %v482_v48  ;;  %v1041_v63 = vpop.eup %1040  ;;  %vm1583_vm6 = vmand %vm265_vm11, %vm308_vm1 }
  0x84   : > { %1054 = vpow2.f32 %v496_v39  ;;  %vm310_vm3 = vcmp.ne.s32.totalorder %v296_v50, 0  ;;  %v332_v7 = vrot.slane %v1411_v9, %v283_v61  ;;  %v514_v6 = vmul.f32 1.442695, %v483_v43  ;;  %vm1593_vm0 = vmand %vm266_vm12, %vm309_vm2 }
  0x85   : > { %1056 = vpow2.f32 %v498_v55  ;;  %vm268_vm5 = vcmp.lt.s32.totalorder %v1536_v59, 4096  ;;  %v336_v1 = vrot.slane %v1411_v9, %v287_v24  ;;  %v340_v47 = vrot.slane %v1411_v9, %v291_v27  ;;  %vm1601_vm1 = vmand %vm267_vm13, %vm310_vm3 }
  0x86   : > { %1058 = vpow2.f32 %v508_v56  ;;  %vm269_vm7 = vcmp.lt.s32.totalorder %v1541_v21, 4096  ;;  %vm311_vm10 = vcmp.ne.s32.totalorder %v300_v5, 0  ;;  %v344_v3 = vrot.slane %v1411_v9, %v295_v37 }
  0x87   : > { %1060 = vpow2.f32 %v510_v57  ;;  %v1043_v12 = vpop.eup %1042  ;;  %v523_v14 = vadd.f32 %v1041_v63, %v1039_v58  ;;  %vm312_vm11 = vcmp.ne.s32.totalorder %v304_v60, 0  ;;  %v517_v15 = vrot.slane %v516_v44, 4  ;;  %vm1615_vm13 = vmand %vm268_vm5, %vm311_vm10 }
  0x88   : > { %1062 = vpow2.f32 %v512_v62  ;;  %v1045_v8 = vpop.eup %1044  ;;  %vm1951_vm12 = vcmp.eq.s32.totalorder %v1416_v13, %v1519_v0  ;;  %v348_v61 = vrot.slane %v1411_v9, %v299_v46  ;;  %v355_v20 = vsel %vm1574_vm4, %v332_v7, 0  ;;  %vm1633_vm3 = vmand %vm269_vm7, %vm312_vm11 }
  0x89   : > { %1064 = vpow2.f32 %v514_v6  ;;  %vm1949_vm2 = vcmp.eq.s32.totalorder %v1471_v45, %v1519_v0  ;;  %v352_v24 = vrot.slane %v1411_v9, %v303_v52  ;;  %v356_v26 = vsel %vm1583_vm6, %v336_v1, 0 }
  0x8a   : > { %v1047_v10 = vpop.eup %1046  ;;  %v357_v17 = vsel %vm1593_vm0, %v340_v47, 0  ;;  %v572_v29 = vsel %vm1956_vm14, %v1035_v33, 0.0  ;;  %v580_v59 = vsel %vm1950_vm15, %v1037_v49, 0.0  ;;  %v358_v30 = vsel %vm1601_vm1, %v344_v3, 0 }
  0x8b   : > { %v1049_v27 = vpop.eup %1048  ;;  %v530_v18 = vadd.f32 %v1047_v10, %v1043_v12  ;;  %v1642_v31 = vrot.slane %v355_v20, %v1428_v19  ;;  %v518_v28 = vadd.f32 %v517_v15, %v516_v44  ;;  %v524_v32 = vrot.slane %v523_v14, 4 }
  0x8c   : > { %v1639_v22 = vpop.eup %1050  ;;  %v537_v34 = vadd.f32 %v1049_v27, %v1045_v8  ;;  %v359_v21 = vsel %vm1615_vm13, %v348_v61, 0  ;;  %v1649_v35 = vrot.slane %v356_v26, %v1428_v19  ;;  %v588_v4 = vadd.f32 %v580_v59, %v572_v29 }
  0x8d   : > { %v1644_v37 = vpop.eup %1052  ;;  %v360_v38 = vsel %vm1633_vm3, %v352_v24, 0  ;;  %v1656_v41 = vrot.slane %v357_v17, %v1428_v19  ;;  %v531_v46 = vrot.slane %v530_v18, 4  ;;  %v573_v36 = vsel %vm1951_vm12, %v1039_v58, 0.0 }
  0x8e   : > { %v1651_v40 = vpop.eup %1054  ;;  %v581_v33 = vsel %vm1949_vm2, %v1041_v63, 0.0  ;;  %v1667_v52 = vrot.slane %v358_v30, %v1428_v19  ;;  %v538_v48 = vrot.slane %v537_v34, 4  ;;  %vm1955_vm5 = vcmp.eq.s32.totalorder %v1416_v13, %v1642_v31 }
  0x8f   : > { %v1658_v42 = vpop.eup %1056  ;;  %vm1952_vm7 = vcmp.eq.s32.totalorder %v1471_v45, %v1642_v31  ;;  %v519_v49 = vrot.slane %v518_v28, 2  ;;  %v525_v50 = vadd.f32 %v524_v32, %v523_v14  ;;  %v1674_v55 = vrot.slane %v359_v21, %v1428_v19 }
  0x90   : > { %v1059_v39 = vpop.eup %1058  ;;  %v1677_v56 = vrot.slane %v360_v38, %v1428_v19  ;;  %vm1953_vm10 = vcmp.eq.s32.totalorder %v1416_v13, %v1649_v35  ;;  %v589_v57 = vrot.slane %v588_v4, 4  ;;  %v595_v58 = vadd.f32 %v581_v33, %v573_v36 }
  0x91   : > { %v1061_v43 = vpop.eup %1060  ;;  %vm400_vm11 = vcmp.eq.s32.totalorder %v1416_v13, %v1656_v41  ;;  %vm1954_vm2 = vcmp.eq.s32.totalorder %v1471_v45, %v1649_v35  ;;  %v532_v44 = vadd.f32 %v531_v46, %v530_v18  ;;  %v539_v62 = vadd.f32 %v538_v48, %v537_v34 }
  0x92   : > { %v1063_v5 = vpop.eup %1062  ;;  %v544_v63 = vadd.f32 %v1059_v39, %v1639_v22  ;;  %v574_v19 = vsel %vm1955_vm5, %v1043_v12, 0.0  ;;  %v582_v7 = vsel %vm1952_vm7, %v1047_v10, 0.0  ;;  %vm401_vm15 = vcmp.eq.s32.totalorder %v1416_v13, %v1667_v52 }
  0x93   : > { %v1065_v60 = vpop.eup %1064  ;;  %v520_v6 = vadd.f32 %v519_v49, %v518_v28  ;;  %v526_v1 = vrot.slane %v525_v50, 2  ;;  %v551_v47 = vadd.f32 %v1061_v43, %v1644_v37  ;;  %vm402_vm12 = vcmp.eq.s32.totalorder %v1416_v13, %v1674_v55 }
  0x94   : > { %v558_v3 = vadd.f32 %v1063_v5, %v1651_v40  ;;  %v575_v12 = vsel %vm1953_vm10, %v1045_v8, 0.0  ;;  %v583_v14 = vsel %vm1954_vm2, %v1049_v27, 0.0  ;;  %vm1961_vm7 = vcmp.eq.s32.totalorder %v1471_v45, %v1656_v41 }
  0x95   : > { %v533_v15 = vrot.slane %v532_v44, 2  ;;  %v565_v61 = vadd.f32 %v1065_v60, %v1658_v42  ;;  %v602_v20 = vadd.f32 %v582_v7, %v574_v19  ;;  %v590_v10 = vadd.f32 %v589_v57, %v588_v4 }
  0x96   : > { %v596_v24 = vrot.slane %v595_v58, 4  ;;  %v540_v26 = vrot.slane %v539_v62, 2  ;;  %v545_v17 = vrot.slane %v544_v63, 4  ;;  %v521_v29 = vrot.slane %v520_v6, 1 }
  0x97   : > { %v527_v59 = vadd.f32 %v526_v1, %v525_v50  ;;  %v552_v30 = vrot.slane %v551_v47, 4  ;;  %v609_v18 = vadd.f32 %v583_v14, %v575_v12  ;;  %vm403_vm10 = vcmp.eq.s32.totalorder %v1416_v13, %v1677_v56 }
  0x98   : > { %vm1960_vm2 = vcmp.eq.s32.totalorder %v1471_v45, %v1667_v52  ;;  %vm1959_vm5 = vcmp.eq.s32.totalorder %v1471_v45, %v1674_v55  ;;  %v559_v8 = vrot.slane %v558_v3, 4  ;;  %vm1957_vm14 = vcmp.eq.s32.totalorder %v1471_v45, %v1677_v56 }
  0x99   : > { %v534_v27 = vadd.f32 %v533_v15, %v532_v44  ;;  %v566_v28 = vrot.slane %v565_v61, 4  ;;  %v603_v32 = vrot.slane %v602_v20, 4  ;;  %v591_v34 = vrot.slane %v590_v10, 2 }
  0x9a   : > { %v597_v21 = vadd.f32 %v596_v24, %v595_v58  ;;  %v541_v4 = vadd.f32 %v540_v26, %v539_v62  ;;  %v546_v38 = vadd.f32 %v545_v17, %v544_v63  ;;  %v522_v46 = vadd.f32 %v521_v29, %v520_v6 }
  0x9b   : > { %v528_v36 = vrot.slane %v527_v59, 1  ;;  %v553_v33 = vadd.f32 %v552_v30, %v551_v47  ;;  %v610_v48 = vrot.slane %v609_v18, 4  ;;  %v560_v49 = vadd.f32 %v559_v8, %v558_v3 }
  0x9c   : > { %v576_v50 = vsel %vm400_vm11, %v1639_v22, 0.0  ;;  %v577_v57 = vsel %vm401_vm15, %v1644_v37, 0.0  ;;  %v578_v58 = vsel %vm402_vm12, %v1651_v40, 0.0  ;;  %v535_v44 = vrot.slane %v534_v27, 1 }
  0x9d   : > { %v567_v62 = vadd.f32 %v566_v28, %v565_v61  ;;  %v584_v63 = vsel %vm1961_vm7, %v1059_v39, 0.0  ;;  %v604_v19 = vadd.f32 %v603_v32, %v602_v20  ;;  %v542_v7 = vrot.slane %v541_v4, 1 }
  0x9e   : > { %v547_v6 = vrot.slane %v546_v38, 2  ;;  %v579_v22 = vsel %vm403_vm10, %v1658_v42, 0.0  ;;  %v585_v37 = vsel %vm1960_vm2, %v1061_v43, 0.0  ;;  %v554_v1 = vrot.slane %v553_v33, 2 }
  0x9f   : > { %v586_v40 = vsel %vm1959_vm5, %v1063_v5, 0.0  ;;  %v587_v39 = vsel %vm1957_vm14, %v1065_v60, 0.0  ;;  %v611_v47 = vadd.f32 %v610_v48, %v609_v18  ;;  %v598_v3 = vrot.slane %v597_v21, 2 }
  0xa0   : > { %v529_v12 = vadd.f32 %v528_v36, %v527_v59  ;;  %v561_v14 = vrot.slane %v560_v49, 2  ;;  %v616_v15 = vadd.f32 %v584_v63, %v576_v50  ;;  %v536_v61 = vadd.f32 %v535_v44, %v534_v27 }
  0xa1   : > { %v568_v42 = vrot.slane %v567_v62, 2  ;;  %v605_v20 = vrot.slane %v604_v19, 2  ;;  %v623_v24 = vadd.f32 %v585_v37, %v577_v57  ;;  %v543_v26 = vadd.f32 %v542_v7, %v541_v4 }
  0xa2   : > { %v548_v43 = vadd.f32 %v547_v6, %v546_v38  ;;  %v630_v17 = vadd.f32 %v586_v40, %v578_v58  ;;  %v637_v29 = vadd.f32 %v587_v39, %v579_v22  ;;  %v592_v30 = vadd.f32 %v591_v34, %v590_v10 }
  0xa3   : > { %v555_v8 = vadd.f32 %v554_v1, %v553_v33  ;;  %v612_v5 = vrot.slane %v611_v47, 2  ;;  %1066 = vrcp.f32 %v522_v46  ;;  %v599_v28 = vadd.f32 %v598_v3, %v597_v21 }
  0xa4   : > { %v562_v32 = vadd.f32 %v561_v14, %v560_v49  ;;  %v617_v60 = vrot.slane %v616_v15, 4  ;;  %1068 = vrcp.f32 %v529_v12  ;;  %v569_v18 = vadd.f32 %v568_v42, %v567_v62 }
  0xa5   : > { %v606_v59 = vadd.f32 %v605_v20, %v604_v19  ;;  %v624_v36 = vrot.slane %v623_v24, 4  ;;  %1070 = vrcp.f32 %v536_v61  ;;  %v549_v27 = vrot.slane %v548_v43, 1 }
  0xa6   : > { %v631_v48 = vrot.slane %v630_v17, 4  ;;  %v638_v50 = vrot.slane %v637_v29, 4  ;;  %1072 = vrcp.f32 %v543_v26  ;;  %v556_v4 = vrot.slane %v555_v8, 1 }
  0xa7   : > { %v613_v38 = vadd.f32 %v612_v5, %v611_v47  ;;  %v593_v57 = vrot.slane %v592_v30, 1  ;;  %v563_v58 = vrot.slane %v562_v32, 1  ;;  %v618_v10 = vadd.f32 %v617_v60, %v616_v15 }
  0xa8   : > { %v600_v34 = vrot.slane %v599_v28, 1  ;;  %v570_v33 = vrot.slane %v569_v18, 1  ;;  %v625_v46 = vadd.f32 %v624_v36, %v623_v24  ;;  %v550_v21 = vadd.f32 %v549_v27, %v548_v43 }
  0xa9   : > { %v607_v49 = vrot.slane %v606_v59, 1  ;;  %v632_v44 = vadd.f32 %v631_v48, %v630_v17  ;;  %v639_v63 = vadd.f32 %v638_v50, %v637_v29  ;;  %v557_v62 = vadd.f32 %v556_v4, %v555_v8 }
  0xaa   : > { %v614_v19 = vrot.slane %v613_v38, 1  ;;  %v594_v7 = vadd.f32 %v593_v57, %v592_v30  ;;  %v564_v6 = vadd.f32 %v563_v58, %v562_v32  ;;  %v619_v22 = vrot.slane %v618_v10, 2 }
  0xab   : > { %v601_v1 = vadd.f32 %v600_v34, %v599_v28  ;;  %v571_v40 = vadd.f32 %v570_v33, %v569_v18  ;;  %v626_v39 = vrot.slane %v625_v46, 2  ;;  %v608_v3 = vadd.f32 %v607_v49, %v606_v59 }
  0xac   : > { %v633_v12 = vrot.slane %v632_v44, 2  ;;  %v640_v14 = vrot.slane %v639_v63, 2  ;;  %1074 = vrcp.f32 %v550_v21  ;;  %v615_v61 = vadd.f32 %v614_v19, %v613_v38 }
  0xad   : > { %v1067_v37 = vpop.eup %1066  ;;  %1076 = vrcp.f32 %v557_v62  ;;  %v620_v20 = vadd.f32 %v619_v22, %v618_v10  ;;  %v627_v26 = vadd.f32 %v626_v39, %v625_v46  ;;  %v1238_v33 = vmov 0.0  }
  0xae   : > { %v1069_v47 = vpop.eup %1068  ;;  %v645_v24 = vmul.f32 %v1067_v37, %v594_v7  ;;  %1078 = vrcp.f32 %v564_v6  ;;  %v634_v17 = vadd.f32 %v633_v12, %v632_v44  ;;  %v641_v29 = vadd.f32 %v640_v14, %v639_v63 }
  0xaf   : > { %v1071_v15 = vpop.eup %1070  ;;  %v647_v43 = vmul.f32 %v1069_v47, %v601_v1  ;;  %1080 = vrcp.f32 %v571_v40  ;;  %v621_v5 = vrot.slane %v620_v20, 1  ;;  %v628_v32 = vrot.slane %v627_v26, 1 }
  0xb0   : > { %v1073_v42 = vpop.eup %1072  ;;  %v649_v30 = vmul.f32 %v1071_v15, %v608_v3  ;;  %v660_v28 = vadd.f32 0.0001, %v645_v24  ;;  %v635_v18 = vrot.slane %v634_v17, 1  ;;  %v642_v59 = vrot.slane %v641_v29, 1 }
  0xb1   : > { %v651_v8 = vmul.f32 %v1073_v42, %v615_v61  ;;  %v661_v60 = vadd.f32 0.0001, %v647_v43  ;;  %v622_v50 = vadd.f32 %v621_v5, %v620_v20  ;;  %v629_v38 = vadd.f32 %v628_v32, %v627_v26 }
  0xb2   : > { %v662_v36 = vadd.f32 0.0001, %v649_v30  ;;  %1082 = vlog2.f32 %v660_v28  ;;  %v636_v58 = vadd.f32 %v635_v18, %v634_v17  ;;  %v643_v10 = vadd.f32 %v642_v59, %v641_v29 }
  0xb3   : > { %v663_v27 = vadd.f32 0.0001, %v651_v8  ;;  %1084 = vlog2.f32 %v661_v60  ;;  %v814_v46 = vsel %vm1479_vm8, 1.0, %v1238_v33  ;;  %v815_v21 = vsel %vm1504_vm9, 1.0, %v1238_v33 }
  0xb4   : > { %1086 = vlog2.f32 %v662_v36  ;;  %vm1958_vm14 = vcmask 1040384   ;;  %v816_v6 = vsel %vm1574_vm4, 1.0, %v1238_v33  ;;  %v817_v37 = vsel %vm1583_vm6, 1.0, %v1238_v33 }
  0xb5   : > { %1088 = vlog2.f32 %v663_v27  ;;  %v845_v19 = vsel %vm1958_vm14, %v814_v46, 0.0  ;;  %v846_v7 = vsel %vm1958_vm14, %v815_v21, 0.0  ;;  %v766_v40 = vsub.f32 1.0, %v660_v28 }
  0xb6   : > { %v1075_v48 = vpop.eup %1074  ;;  %v767_v39 = vsub.f32 1.0, %v661_v60  ;;  %v847_v47 = vadd.f32 %v846_v7, %v845_v19  ;;  %v768_v15 = vsub.f32 1.0, %v662_v36  ;;  %v848_v61 = vsel %vm1958_vm14, %v816_v6, 0.0 }
  0xb7   : > { %v1077_v4 = vpop.eup %1076  ;;  %v653_v49 = vmul.f32 %v1075_v48, %v622_v50  ;;  %v769_v20 = vsub.f32 1.0, %v663_v27  ;;  %v1761_v43 = vsel %vm1593_vm0, 1.0, %v1238_v33  ;;  %v1764_v8 = vsel %vm1958_vm14, %v817_v37, 0.0 }
  0xb8   : > { %v1079_v57 = vpop.eup %1078  ;;  %v655_v44 = vmul.f32 %v1077_v4, %v629_v38  ;;  %v1766_v28 = vmul.f32 %v766_v40, %v766_v40  ;;  %v1768_v32 = vmul.f32 %v767_v39, %v767_v39  ;;  %v1770_v60 = vadd.f32 %v848_v61, %v847_v47 }
  0xb9   : > { %v1081_v34 = vpop.eup %1080  ;;  %v657_v63 = vmul.f32 %v1079_v57, %v636_v58  ;;  %v664_v22 = vadd.f32 0.0001, %v653_v49  ;;  %v1776_v27 = vmul.f32 %v768_v15, %v768_v15  ;;  %v1778_v48 = vmul.f32 %v769_v20, %v769_v20 }
  0xba   : > { %v659_v62 = vmul.f32 %v1081_v34, %v643_v10  ;;  %v665_v1 = vadd.f32 0.0001, %v655_v44  ;;  %vm1983_vm14 = vcmp.eq.s32.totalorder %v1416_v13, %v1516_v16  ;;  %vm1984_vm5 = vcmp.eq.s32.totalorder %v1416_v13, %v1519_v0 }
  0xbb   : > { %v666_v12 = vadd.f32 0.0001, %v657_v63  ;;  %v770_v24 = vsub.f32 1.0, %v664_v22  ;;  %1090 = vlog2.f32 %v664_v22  ;;  %vm1985_vm2 = vcmp.eq.s32.totalorder %v1416_v13, %v1642_v31 }
  0xbc   : > { %v1083_v3 = vpop.eup %1082  ;;  %v667_v14 = vadd.f32 0.0001, %v659_v62  ;;  %v771_v26 = vsub.f32 1.0, %v665_v1  ;;  %1092 = vlog2.f32 %v665_v1  ;;  %vm1986_vm7 = vcmp.eq.s32.totalorder %v1416_v13, %v1649_v35 }
  0xbd   : > { %v1085_v42 = vpop.eup %1084  ;;  %v772_v29 = vsub.f32 1.0, %v666_v12  ;;  %v1772_v59 = vmul.f32 0.6931472, %v1083_v3  ;;  %1094 = vlog2.f32 %v666_v12  ;;  %v1780_v50 = vmul.f32 %v770_v24, %v770_v24 }
  0xbe   : > { %v1087_v17 = vpop.eup %1086  ;;  %v773_v30 = vsub.f32 1.0, %v667_v14  ;;  %v1774_v36 = vmul.f32 0.6931472, %v1085_v42  ;;  %1096 = vlog2.f32 %v667_v14  ;;  %v1782_v4 = vmul.f32 %v771_v26, %v771_v26 }
  0xbf   : > { %v1089_v5 = vpop.eup %1088  ;;  %v1784_v38 = vmul.f32 0.6931472, %v1087_v17  ;;  %v1788_v58 = vmul.f32 %v772_v29, %v772_v29  ;;  %v820_v23 = vsel %vm1615_vm13, 1.0, %v1238_v33 }
  0xc0   : > { %v1786_v57 = vmul.f32 0.6931472, %v1089_v5  ;;  %v1790_v10 = vmul.f32 %v773_v30, %v773_v30 }
  0xc5   : > { %v1840_v3 = vpop.eup %1090 }
  0xc6   : > { %v1842_v61 = vpop.eup %1092 }
  0xdc   : > { %v687_v18 = vpop.permute.xlu0 %686 }
  0xdd   : > { %v694_v34 = vsel %vm1983_vm14, %v687_v18, 0.0  ;;  %v695_v46 = vsel %vm1984_vm5, %v687_v18, 0.0  ;;  %v696_v21 = vsel %vm1985_vm2, %v687_v18, 0.0  ;;  %v697_v49 = vsel %vm1986_vm7, %v687_v18, 0.0 }
  0xde   : > { %v698_v63 = vsel %vm400_vm11, %v687_v18, 0.0  ;;  %v699_v62 = vsel %vm401_vm15, %v687_v18, 0.0  ;;  %v700_v19 = vsel %vm402_vm12, %v687_v18, 0.0  ;;  %v701_v7 = vsel %vm403_vm10, %v687_v18, 0.0 }
  0xdf   : > { %vm1987_vm14 = vcmp.eq.s32.totalorder %v1471_v45, %v1516_v16  ;;  %vm1988_vm2 = vcmp.eq.s32.totalorder %v1471_v45, %v1519_v0  ;;  %vm1989_vm5 = vcmp.eq.s32.totalorder %v1471_v45, %v1642_v31  ;;  %vm1990_vm15 = vcmp.eq.s32.totalorder %v1471_v45, %v1649_v35 }
  0xe0   : > { %v692_v44 = vpop.permute.xlu0 %691  ;;  %vm1991_vm12 = vcmp.eq.s32.totalorder %v1471_v45, %v1656_v41  ;;  %vm1992_vm7 = vcmp.eq.s32.totalorder %v1471_v45, %v1667_v52  ;;  %vm1993_vm10 = vcmp.eq.s32.totalorder %v1471_v45, %v1674_v55  ;;  %vm1994_vm11 = vcmp.eq.s32.totalorder %v1471_v45, %v1677_v56  ;;  %v1844_v55 = vpop.eup %1094 }
  0xe1   : > { %v702_v6 = vsel %vm1987_vm14, %v692_v44, 0.0  ;;  %v703_v22 = vsel %vm1988_vm2, %v692_v44, 0.0  ;;  %v704_v37 = vsel %vm1989_vm5, %v692_v44, 0.0  ;;  %v705_v1 = vsel %vm1990_vm15, %v692_v44, 0.0  ;;  %v1846_v29 = vpop.eup %1096 }
  0xe2   : > { %v710_v40 = vadd.f32 %v702_v6, %v694_v34  ;;  %v717_v39 = vadd.f32 %v703_v22, %v695_v46  ;;  %v706_v13 = vsel %vm1991_vm12, %v692_v44, 0.0  ;;  %v707_v16 = vsel %vm1992_vm7, %v692_v44, 0.0 }
  0xe3   : > { %v708_v0 = vsel %vm1993_vm10, %v692_v44, 0.0  ;;  %v709_v31 = vsel %vm1994_vm11, %v692_v44, 0.0  ;;  %v724_v35 = vadd.f32 %v704_v37, %v696_v21  ;;  %v731_v47 = vadd.f32 %v705_v1, %v697_v49 }
  0xe4   : > { %v711_v12 = vrot.slane %v710_v40, 4  ;;  %v718_v14 = vrot.slane %v717_v39, 4  ;;  %v738_v41 = vadd.f32 %v706_v13, %v698_v63  ;;  %v745_v15 = vadd.f32 %v707_v16, %v699_v62 }
  0xe5   : > { %v725_v52 = vrot.slane %v724_v35, 4  ;;  %v732_v42 = vrot.slane %v731_v47, 4  ;;  %v752_v20 = vadd.f32 %v708_v0, %v700_v19  ;;  %v759_v24 = vadd.f32 %v709_v31, %v701_v7 }
  0xe6   : > { %v712_v26 = vadd.f32 %v711_v12, %v710_v40  ;;  %v719_v17 = vadd.f32 %v718_v14, %v717_v39  ;;  %v739_v45 = vrot.slane %v738_v41, 4  ;;  %v746_v56 = vrot.slane %v745_v15, 4 }
  0xe7   : > { %v726_v30 = vadd.f32 %v725_v52, %v724_v35  ;;  %v733_v5 = vadd.f32 %v732_v42, %v731_v47  ;;  %v753_v18 = vrot.slane %v752_v20, 4  ;;  %v760_v34 = vrot.slane %v759_v24, 4 }
  0xe8   : > { %v713_v46 = vrot.slane %v712_v26, 2  ;;  %v720_v21 = vrot.slane %v719_v17, 2  ;;  %v740_v49 = vadd.f32 %v739_v45, %v738_v41  ;;  %v747_v44 = vadd.f32 %v746_v56, %v745_v15 }
  0xe9   : > { %v727_v63 = vrot.slane %v726_v30, 2  ;;  %v734_v62 = vrot.slane %v733_v5, 2  ;;  %v754_v19 = vadd.f32 %v753_v18, %v752_v20  ;;  %v761_v7 = vadd.f32 %v760_v34, %v759_v24 }
  0xea   : > { %v714_v6 = vadd.f32 %v713_v46, %v712_v26  ;;  %v721_v22 = vadd.f32 %v720_v21, %v719_v17  ;;  %v741_v37 = vrot.slane %v740_v49, 2  ;;  %v748_v1 = vrot.slane %v747_v44, 2 }
  0xeb   : > { %v728_v40 = vadd.f32 %v727_v63, %v726_v30  ;;  %v735_v39 = vadd.f32 %v734_v62, %v733_v5  ;;  %v755_v13 = vrot.slane %v754_v19, 2  ;;  %v762_v16 = vrot.slane %v761_v7, 2 }
  0xec   : > { %v715_v0 = vrot.slane %v714_v6, 1  ;;  %v722_v31 = vrot.slane %v721_v22, 1  ;;  %v742_v35 = vadd.f32 %v741_v37, %v740_v49  ;;  %v749_v47 = vadd.f32 %v748_v1, %v747_v44 }
  0xed   : > { %v729_v12 = vrot.slane %v728_v40, 1  ;;  %v736_v14 = vrot.slane %v735_v39, 1  ;;  %v756_v41 = vadd.f32 %v755_v13, %v754_v19  ;;  %v763_v15 = vadd.f32 %v762_v16, %v761_v7 }
  0xee   : > { %v716_v52 = vadd.f32 %v715_v0, %v714_v6  ;;  %v723_v42 = vadd.f32 %v722_v31, %v721_v22  ;;  %v743_v20 = vrot.slane %v742_v35, 1  ;;  %v750_v24 = vrot.slane %v749_v47, 1 }
  0xef   : > { %v730_v26 = vadd.f32 %v729_v12, %v728_v40  ;;  %v737_v17 = vadd.f32 %v736_v14, %v735_v39  ;;  %v757_v45 = vrot.slane %v756_v41, 1  ;;  %v764_v56 = vrot.slane %v763_v15, 1 }
  0xf0   : > { %v744_v30 = vadd.f32 %v743_v20, %v742_v35  ;;  %v751_v5 = vadd.f32 %v750_v24, %v749_v47  ;;  %v782_v18 = vsub.f32 0.0, %v716_v52  ;;  %v783_v34 = vsub.f32 0.0, %v723_v42 }
  0xf1   : > { %v758_v46 = vadd.f32 %v757_v45, %v756_v41  ;;  %v765_v21 = vadd.f32 %v764_v56, %v763_v15  ;;  %v784_v49 = vsub.f32 0.0, %v730_v26  ;;  %v785_v44 = vsub.f32 0.0, %v737_v17 }
  0xf2   : > { %v786_v63 = vsub.f32 0.0, %v744_v30  ;;  %v787_v62 = vsub.f32 0.0, %v751_v5  ;;  %v790_v19 = vmul.f32 %v782_v18, %v1766_v28  ;;  %v791_v7 = vmul.f32 %v783_v34, %v1768_v32 }
  0xf3   : > { %v677_v6 = vmul.f32 0.6931472, %v1840_v3  ;;  %v788_v22 = vsub.f32 0.0, %v758_v46  ;;  %v792_v37 = vmul.f32 %v784_v49, %v1776_v27  ;;  %v793_v1 = vmul.f32 %v785_v44, %v1778_v48 }
  0xf4   : > { %v679_v40 = vmul.f32 0.6931472, %v1842_v61  ;;  %v794_v39 = vmul.f32 %v786_v63, %v1780_v50  ;;  %v798_v13 = vmul.f32 %v790_v19, %v1772_v59  ;;  %v799_v16 = vmul.f32 %v791_v7, %v1774_v36  ;;  %v844_v63 = vld [vmem:[#allocation3] sm:$0x1] }
  0xf5   : > { %v789_v0 = vsub.f32 0.0, %v765_v21  ;;  %v795_v28 = vmul.f32 %v787_v62, %v1782_v4  ;;  %v800_v32 = vmul.f32 %v792_v37, %v1784_v38  ;;  %v801_v3 = vmul.f32 %v793_v1, %v1786_v57  ;;  %v822_v21 = vld [vmem:[#allocation2] sm:$0x1] }
  0xf6   : > { %v806_v27 = vsel %vm1479_vm8, %v798_v13, 0.0  ;;  %v807_v48 = vsel %vm1504_vm9, %v799_v16, 0.0  ;;  %v819_v50 = vsel %vm1601_vm1, 1.0, %v1238_v33  ;;  %v851_v59 = vadd.f32 %v1764_v8, %v1770_v60 }
  0xf7   : > { %v681_v36 = vmul.f32 0.6931472, %v1844_v55  ;;  %v796_v4 = vmul.f32 %v788_v22, %v1788_v58  ;;  %v802_v38 = vmul.f32 %v794_v39, %v677_v6  ;;  %v808_v57 = vsel %vm1574_vm4, %v800_v32, 0.0 }
  0xf8   : > { %v683_v51 = vmul.f32 0.6931472, %v1846_v29  ;;  %vm1995_vm8 = vcmask 1040384   ;;  %v797_v35 = vmul.f32 %v789_v0, %v1790_v10  ;;  %v803_v8 = vmul.f32 %v795_v28, %v679_v40 }
  0xf9   : > { %v824_v25 = vsel %vm1995_vm8, %v806_v27, 0.0  ;;  %vm1996_vm9 = vmmov %vm1995_vm8  ;;  %v809_v60 = vsel %vm1583_vm6, %v801_v3, 0.0  ;;  %v804_v53 = vmul.f32 %v796_v4, %v681_v36  ;;  %v810_v29 = vsel %vm1593_vm0, %v802_v38, 0.0 }
  0xfa   : > { %v825_v61 = vsel %vm1996_vm9, %v807_v48, 0.0  ;;  %vm1997_vm14 = vmmov %vm1995_vm8  ;;  %v811_v10 = vsel %vm1601_vm1, %v803_v8, 0.0  ;;  %v821_v45 = vsel %vm1633_vm3, 1.0, %v1238_v33  ;;  %vm842_vm7 = vcmask 0  }
  0xfb   : > { %v852_v31 = vsel %vm1997_vm14, %v1761_v43, 0.0  ;;  %v826_v58 = vadd.f32 %v825_v61, %v824_v25  ;;  %vm1998_vm2 = vmmov %vm1995_vm8  ;;  %v805_v43 = vmul.f32 %v797_v35, %v683_v51  ;;  %v812_v11 = vsel %vm1615_vm13, %v804_v53, 0.0 }
  0xfc   : > { %v827_v55 = vsel %vm1998_vm2, %v808_v57, 0.0  ;;  %v853_v12 = vadd.f32 %v852_v31, %v851_v59  ;;  %vm1999_vm4 = vmmov %vm1998_vm2 }
  0xfd   : > { %v828_v47 = vadd.f32 %v827_v55, %v826_v58  ;;  %v829_v14 = vsel %vm1999_vm4, %v809_v60, 0.0  ;;  %vm2000_vm5 = vmmov %vm1998_vm2  ;;  %v813_v54 = vsel %vm1633_vm3, %v805_v43, 0.0 }
  0xfe   : > { %v854_v41 = vsel %vm2000_vm5, %v819_v50, 0.0  ;;  %vm2001_vm6 = vmmov %vm1998_vm2 }
  0xff   : > { %v830_v15 = vadd.f32 %v829_v14, %v828_v47  ;;  %v831_v52 = vsel %vm2001_vm6, %v810_v29, 0.0  ;;  %v855_v20 = vadd.f32 %v854_v41, %v853_v12  ;;  %vm2002_vm0 = vmmov %vm1998_vm2 }
 0x100   : > { %v833_v24 = vsel %vm2002_vm0, %v811_v10, 0.0  ;;  %vm2003_vm15 = vmmov %vm2002_vm0 }
 0x101   : > { %v832_v42 = vadd.f32 %v831_v52, %v830_v15  ;;  %v856_v26 = vsel %vm2003_vm15, %v820_v23, 0.0  ;;  %vm2004_vm1 = vmmov %vm2002_vm0 }
 0x102   : > { %v835_v56 = vsel %vm2004_vm1, %v812_v11, 0.0  ;;  %v857_v5 = vadd.f32 %v856_v26, %v855_v20  ;;  %vm2005_vm12 = vmmov %vm2002_vm0 }
 0x103   : > { %v834_v17 = vadd.f32 %v833_v24, %v832_v42  ;;  %v837_v2 = vsel %vm2005_vm12, %v813_v54, 0.0  ;;  %vm2006_vm13 = vmmov %vm2002_vm0 }
 0x104   : > { %v858_v18 = vsel %vm2006_vm13, %v821_v45, 0.0 }
 0x105   : > { %v836_v30 = vadd.f32 %v835_v56, %v834_v17  ;;  %v859_v46 = vadd.f32 %v858_v18, %v857_v5 }
 0x107   : > { %v838_v34 = vadd.f32 %v837_v2, %v836_v30 }
 0x109   : > { %839 = vadd.xlane.f32.xlu1 %v838_v34 }
 0x10d   : > { %860 = vadd.xlane.f32.xlu1 %v859_v46 }
 0x196   : > { %v840_v49 = vpop.xlane.xlu1 %839 }
 0x197   : > { %v841_v44 = vadd.f32 %v840_v49, %v822_v21  ;;  %867 = sbr.rel (%p968_p8) target bundleno = 437 (0x1b5), region = 48 }
 0x199   : > { %843 = vst.msk [vmem:[#allocation2] sm:$0x1] %vm842_vm7, %v841_v44 }
 0x19a   : > { %v861_v9 = vpop.xlane.xlu1 %860 }
 0x19b   : > { %v862_v33 = vadd.f32 %v861_v9, %v844_v63 }
 0x19d   : > { %863 = vst.msk [vmem:[#allocation3] sm:$0x1] %vm842_vm7, %v862_v33 }
 0x1a0   : > { %v868_v7 = vld [vmem:[#allocation2] sm:$0x1] }
 0x1a4   : > { %v869_v62 = vld [vmem:[#allocation3] sm:$0x1] }
 0x1a5   : > { %v870_v19 = vadd.f32 1.0, %v869_v62 }
 0x1a7   : > { %1098 = vrcp.f32 %v870_v19 }
 0x1b1   : > { %v1099_v6 = vpop.eup %1098 }
 0x1b2   : > { %v872_v22 = vmul.f32 %v1099_v6, %v868_v7 }
 0x1b4   : > { %873 = vst.msk [vmem:[#allocation9] sm:$0x1] %vm842_vm7, %v872_v22 }
 0x1b5 PF: > { %p991_p3 = scmp.eq.s32.totalorder %s1279_s16, 3  ;;  %s1239_s29 = smov [#allocation9]  }
 0x1b6   : > { %s881_s15 = sshll.u32 %s1239_s29, 4  ;;  %s882_s15 = int_to_ptr.vmem [resolvable:$true] %s881_s15 }
 0x1b7   : > { %s1160_s4 = scalar_lea.vmem %s882_s15, 16  ;;  %s1166_s11 = scalar_lea.vmem %s882_s15, 32 }
 0x1b8   : > { %p1161_p13 = scmp.ne.s32.totalorder %s882_s15, %s1160_s4  ;;  %p1167_p12 = scmp.lt.s32.totalorder %s882_s15, %s882_s15 }
 0x1b9   : > { %p1168_p2 = scmp.lt.s32.totalorder %s1166_s11, %s1160_s4 }
 0x1ba   : > { %p1162_p0 = pnand %p1161_p13, %p991_p3 }
 0x1bb   : > { %p1169_p4 = por %p1168_p2, %p1167_p12 }
 0x1bc   : > { %p1163_p1 = pneg %p1162_p0 }
 0x1be   : > { %p1170_p5 = pnand %p1169_p4, %p1163_p1 }
 0x1c0   : > { %1173 = shalt.err (!%p1170_p5)
}
 0x1c1   : > { %s1174_s22 = scalar_lea.hbm %s1947_s3, 16 }
 0x1c2   : > { %p1175_p9 = scmp.ne.s32.totalorder %s1947_s3, %s1174_s22  ;;  %p1180_p10 = scmp.lt.u32.totalorder %s1174_s22, %s1947_s3 }
 0x1c4   : > { %p1176_p11 = pnand %p1175_p9, %p991_p3 }
 0x1c6   : > { %p1177_p6 = pneg %p1176_p11 }
 0x1c8   : > { %p1182_p7 = pnand %p1180_p10, %p1177_p6 }
 0x1ca   : > { %1185 = shalt.err (!%p1182_p7)
}
 0x1cb   : > { %980 = dma.vmem_to_hbm [thread:$0]  (%p991_p3), %s882_s15, 16, %s1947_s3, [#allocation6]  }
 0x1cc   : > { %1211 = dma.done.wait (%p991_p3), [#allocation6], 16  }
 0x1cd   : > { %1213 = vsyncadd (%p991_p3), [#allocation6], 4294967280 }
 0x1ce PF: > { %p17_p8 = scmp.ge.s32.totalorder %s1282_s17, 6   ;;  %s2007_s12 = smov %s1220_s13 }
 0x1cf   : > { %s2008_s13 = smov %s1224_s14  ;;  %s2009_s14 = smov %s1292_s20 }
 0x1d0   : > { %s2010_s15 = smov %s1282_s17  ;;  %19 = sbr.rel (!%p17_p8) target bundleno = 6 (0x6), region = 90 }
 0x1d7   :  { %894 = vsyncpa [#allocation5], 1 }
 0x1d8   :  { %896 = vsyncpa [#allocation5 + $0x1], 1 }
 0x1d9   :  { %897 = vsyncpa [#allocation8], 1 }
 0x1da   :  { %899 = vsyncpa [#allocation8 + $0x1], 1 }
 0x1db   :  { %900 = vsyncpa [#allocation6], 1 }
 0x1dc   :  { %902 = vsyncpa [#allocation6 + $0x1], 1 }

</bundles_post_ra>
